<compile_context>
chip_gen: v7x
topology: tpu7x:2x2x1
jax: 0.10.0
libtpu: 0.0.40
codegen_flags: <defaults>
</compile_context>

<pallas_src>
import jax
import jax.numpy as jnp
from jax.experimental import pallas as pl
from jax.experimental.pallas import tpu as pltpu


# -----------------------------------------------------------------------------
# Tiling helpers
# -----------------------------------------------------------------------------
def _chan_tile(c, cap):
  """Largest legal channel tile: full if c <= cap, else a multiple of 128."""
  if c <= cap:
    return c
  for t in (256, 128):
    if t <= cap and c % t == 0:
      return t
  return c


# -----------------------------------------------------------------------------
# Fused Conv2d + (folded) BatchNorm + optional ReLU kernel
# -----------------------------------------------------------------------------
def conv_bn_act(x, w, scale, bias, relu, out_dtype=jnp.bfloat16):
  """x: (N,H,W,Cin), w: (KH,KW,Cin,Cout), scale/bias: (Cout,) per-channel.

  Computes  y = act( conv2d_same(x, w) * scale + bias ).
  Conv bias and BatchNorm affine are pre-folded into scale/bias.
  Matmuls run in bf16 with an f32 accumulator.
  """
  N, H, W, Cin = x.shape
  KH, KW, _, Cout = w.shape
  ph, pw = KH // 2, KW // 2

  x = x.astype(jnp.bfloat16)
  w = w.astype(jnp.bfloat16)
  if ph or pw:
    # TODO(synk): padding is materialized once per layer in HBM; at large
    # resolutions handle the halo in-kernel with H-strip tiling instead.
    x = jnp.pad(x, ((0, 0), (ph, ph), (pw, pw), (0, 0)))
  Hp, Wp = H + 2 * ph, W + 2 * pw

  # 256-wide channel tiles for 3x3 / 1x1 convs, 128 for big-kernel head convs
  # (keeps the double-buffered bf16 weight block small enough for v7x VMEM).
  cap = 256 if KH * KW <= 9 else 128
  ci_t = _chan_tile(Cin, cap)
  co_t = _chan_tile(Cout, cap)
  n_ci, n_co = Cin // ci_t, Cout // co_t
  M = N * H * W  # batch folded into the matmul M dim

  sc2 = scale.reshape(1, Cout).astype(jnp.float32)
  bi2 = bias.reshape(1, Cout).astype(jnp.float32)

  def kernel(x_ref, w_ref, s_ref, b_ref, o_ref, acc_ref):
    ci = pl.program_id(1)

    xv = x_ref[...]                                   # (N, Hp, Wp, ci_t) bf16
    acc = jnp.zeros((M, co_t), jnp.float32)
    for dx in range(KW):                              # sublane (W) shift hoisted
      xw = xv[:, :, dx:dx + W, :]                     # (N, Hp, W, ci_t)
      for dy in range(KH):                            # leading-dim slice: cheap
        patch = xw[:, dy:dy + H, :, :].reshape(M, ci_t)
        acc = acc + jnp.dot(patch, w_ref[dy, dx],
                            preferred_element_type=jnp.float32)

    @pl.when(ci == 0)
    def _():
      acc_ref[...] = acc

    @pl.when(ci > 0)
    def _():
      acc_ref[...] += acc

    @pl.when(ci == n_ci - 1)
    def _():
      y = acc_ref[...] * s_ref[...] + b_ref[...]
      if relu:
        y = jnp.maximum(y, 0.0)
      o_ref[...] = y.reshape(N, H, W, co_t).astype(o_ref.dtype)

  return pl.pallas_call(
      kernel,
      out_shape=jax.ShapeDtypeStruct((N, H, W, Cout), out_dtype),
      grid_spec=pltpu.PrefetchScalarGridSpec(
          num_scalar_prefetch=0,
          grid=(n_co, n_ci),                 # Cin reduction axis trailing
          in_specs=[
              pl.BlockSpec((N, Hp, Wp, ci_t), lambda co, ci: (0, 0, 0, ci)),
              pl.BlockSpec((KH, KW, ci_t, co_t), lambda co, ci: (0, 0, ci, co)),
              pl.BlockSpec((1, co_t), lambda co, ci: (0, co)),
              pl.BlockSpec((1, co_t), lambda co, ci: (0, co)),
          ],
          out_specs=pl.BlockSpec((N, H, W, co_t), lambda co, ci: (0, 0, 0, co)),
          scratch_shapes=[pltpu.VMEM((M, co_t), jnp.float32)],
      ),
      compiler_params=pltpu.CompilerParams(
          dimension_semantics=("parallel", "arbitrary"),
          vmem_limit_bytes=32 * 1024 * 1024),
  )(x, w, sc2, bi2)


# -----------------------------------------------------------------------------
# 2x2 / stride-2 max pooling kernel
# -----------------------------------------------------------------------------
def maxpool2x2(x):
  """x: (N,H,W,C) with even H, W -> (N,H/2,W/2,C)."""
  N, H, W, C = x.shape
  assert H % 2 == 0 and W % 2 == 0
  H2, W2 = H // 2, W // 2
  # Free (row-major contiguous) reshape in the wrapper exposes the pooling
  # pairs as their own axes -> no strided slicing and no scratch in-kernel.
  x6 = x.reshape(N, H2, 2, W2, 2, C)

  def kernel(x_ref, o_ref):
    xv = x_ref[...]                               # (1, H2, 2, W2, 2, C)
    a = jnp.maximum(xv[:, :, 0], xv[:, :, 1])     # (1, H2, W2, 2, C)
    o_ref[...] = jnp.max(a, axis=3)               # (1, H2, W2, C)

  return pl.pallas_call(
      kernel,
      out_shape=jax.ShapeDtypeStruct((N, H2, W2, C), x.dtype),
      grid_spec=pltpu.PrefetchScalarGridSpec(
          num_scalar_prefetch=0,
          grid=(N,),
          in_specs=[pl.BlockSpec((1, H2, 2, W2, 2, C),
                                 lambda n: (n, 0, 0, 0, 0, 0))],
          out_specs=pl.BlockSpec((1, H2, W2, C), lambda n: (n, 0, 0, 0)),
      ),
      compiler_params=pltpu.CompilerParams(
          dimension_semantics=("parallel",)),
  )(x6)


# -----------------------------------------------------------------------------
# Final 1x1 conv (Cout=1, no BN, no ReLU) with a lane-dense output layout
# -----------------------------------------------------------------------------
def conv1x1_to_scalar(x, w, b):
  """x: (N,H,W,C), w: (C,), b: (1,)  ->  (N,H,W,1) f32.

  Output is produced as (N,H,W) with W on lanes instead of a width-1 channel
  block (avoids masked partial stores on the last dim).
  """
  N, H, W, C = x.shape
  w2 = w.reshape(1, C).astype(jnp.float32)
  b2 = jnp.reshape(b, (1, 1)).astype(jnp.float32)

  def kernel(x_ref, w_ref, b_ref, o_ref):
    xv = x_ref[...].astype(jnp.float32)           # (1, H, W, C)
    wv = w_ref[...].reshape(1, 1, 1, C)
    o_ref[...] = jnp.sum(xv * wv, axis=-1) + b_ref[...]   # (1, H, W)

  out = pl.pallas_call(
      kernel,
      out_shape=jax.ShapeDtypeStruct((N, H, W), jnp.float32),
      grid_spec=pltpu.PrefetchScalarGridSpec(
          num_scalar_prefetch=0,
          grid=(N,),
          in_specs=[
              pl.BlockSpec((1, H, W, C), lambda n: (n, 0, 0, 0)),
              pl.BlockSpec((1, C), lambda n: (0, 0)),
              pl.BlockSpec((1, 1), lambda n: (0, 0)),
          ],
          out_specs=pl.BlockSpec((1, H, W), lambda n: (n, 0, 0)),
      ),
      compiler_params=pltpu.CompilerParams(
          dimension_semantics=("parallel",)),
  )(x.astype(jnp.bfloat16), w2, b2)
  return out[..., None]


# -----------------------------------------------------------------------------
# Small-Cin convs: im2col (XLA wrapper) -> single dense 1x1 conv
# -----------------------------------------------------------------------------
def _im2col(x, kh, kw):
  N, H, W, C = x.shape
  ph, pw = kh // 2, kw // 2
  xp = jnp.pad(x, ((0, 0), (ph, ph), (pw, pw), (0, 0)))
  cols = [xp[:, dy:dy + H, dx:dx + W, :]
          for dy in range(kh) for dx in range(kw)]
  return jnp.concatenate(cols, axis=-1)           # (N, H, W, kh*kw*C)


def conv_layer(h, p, relu):
  w, sc, bi = p
  kh, kw, cin, cout = w.shape
  if cin <= 8 and kh * kw > 1:
    # Cin=3 layers: a K=3 MXU contraction at 3/128 lane occupancy is wasteful.
    h = _im2col(h, kh, kw)
    w = w.reshape(1, 1, kh * kw * cin, cout)      # matches (dy, dx, ci) order
  return conv_bn_act(h, w, sc, bi, relu)


# -----------------------------------------------------------------------------
# Deterministic parameter construction (module shapes, synthetic values)
# -----------------------------------------------------------------------------
def make_conv_params(key, kh, kw, cin, cout, with_bn):
  k1, k2, k3, k4 = jax.random.split(key, 4)
  std = (2.0 / (kh * kw * cin)) ** 0.5
  w = jax.random.normal(k1, (kh, kw, cin, cout), jnp.float32) * std
  b = jax.random.normal(k2, (cout,), jnp.float32) * 0.01
  if with_bn:
    gamma = 1.0 + 0.1 * jax.random.normal(k3, (cout,), jnp.float32)
    beta = 0.1 * jax.random.normal(k4, (cout,), jnp.float32)
    running_mean = jnp.zeros((cout,), jnp.float32)
    running_var = jnp.ones((cout,), jnp.float32)
    eps = 1e-5
    scale = gamma / jnp.sqrt(running_var + eps)
    shift = beta - running_mean * scale
  else:
    scale = jnp.ones((cout,), jnp.float32)
    shift = jnp.zeros((cout,), jnp.float32)
  fused_bias = b * scale + shift   # (conv + b)*scale + shift
  # Weights stored / streamed as bf16 (MXU-native); affine stays f32.
  return w.astype(jnp.bfloat16), scale, fused_bias


# VGG16 features[:23]: convs (all 3x3, pad 1, ReLU) and 'M' = 2x2 maxpool.
VGG_CFG = [(3, 64), (64, 64), 'M',
           (64, 128), (128, 128), 'M',
           (128, 256), (256, 256), (256, 256), 'M',
           (256, 512), (512, 512), (512, 512)]

# Heads: (cin, cout, k). Last conv of each head: 1x1, no BN, no ReLU.
L1_CFG = [(512, 384, 9), (384, 256, 9), (256, 128, 7), (128, 64, 5), (64, 1, 1)]
L2_CFG = [(512, 256, 7), (256, 128, 7), (128, 64, 5), (64, 32, 3), (32, 1, 1)]
L3_CFG = [(512, 128, 5), (128, 64, 5), (64, 32, 3), (32, 16, 3), (16, 1, 1)]
FUSION_CFG = [(3, 64, 7), (64, 32, 5), (32, 16, 3), (16, 1, 1)]


def build_params(key):
  params = {'vgg': [], 'l1': [], 'l2': [], 'l3': [], 'fusion': []}
  for item in VGG_CFG:
    if item == 'M':
      continue
    cin, cout = item
    key, sub = jax.random.split(key)
    params['vgg'].append(make_conv_params(sub, 3, 3, cin, cout, with_bn=False))
  for name, cfg in (('l1', L1_CFG), ('l2', L2_CFG),
                    ('l3', L3_CFG), ('fusion', FUSION_CFG)):
    n = len(cfg)
    for i, (cin, cout, k) in enumerate(cfg):
      key, sub = jax.random.split(key)
      with_bn = i < n - 1  # last conv has no BN
      params[name].append(make_conv_params(sub, k, k, cin, cout, with_bn))
  return params


# -----------------------------------------------------------------------------
# Forward pass
# -----------------------------------------------------------------------------
def run_head(feat, plist):
  """Conv+BN+ReLU chain; last layer is the 1x1 Cout=1 conv (no BN/ReLU)."""
  h = feat
  for p in plist[:-1]:
    h = conv_layer(h, p, relu=True)
  w, _, bi = plist[-1]       # scale == 1 for the last layer (no BN)
  return conv1x1_to_scalar(h, w.reshape(-1), bi)


def padnet_forward(x_nchw, params, mode=None):
  # NCHW (PyTorch) -> NHWC (kernel layout), bf16 activations between layers.
  h = jnp.transpose(x_nchw, (0, 2, 3, 1)).astype(jnp.bfloat16)

  # VGG16 feature extractor (features[:23])
  conv_idx = 0
  for item in VGG_CFG:
    if item == 'M':
      h = maxpool2x2(h)
    else:
      p = params['vgg'][conv_idx]
      conv_idx += 1
      h = conv_layer(h, p, relu=True)
  feature = h  # (N, H/8, W/8, 512)

  if mode == 'l1':
    out = run_head(feature, params['l1'])
  elif mode == 'l2':
    out = run_head(feature, params['l2'])
  elif mode == 'l3':
    out = run_head(feature, params['l3'])
  else:
    y1 = run_head(feature, params['l1'])
    y2 = run_head(feature, params['l2'])
    y3 = run_head(feature, params['l3'])
    y_cat = jnp.concatenate([y1, y2, y3], axis=-1)  # == torch.cat(dim=1) in NCHW
    out = run_head(y_cat, params['fusion'])

  # NHWC -> NCHW to match the PyTorch module's output convention
  return jnp.transpose(out, (0, 3, 1, 2))


# -----------------------------------------------------------------------------
if __name__ == "__main__":
  key = jax.random.PRNGKey(0)
  key_x, key_p = jax.random.split(key)

  # Small input: batch=2, 3 channels, 16x16 spatial (VGG downsamples by 8 -> 2x2).
  x = jax.random.normal(key_x, (2, 3, 16, 16), jnp.float32)
  params = build_params(key_p)

  out = padnet_forward(x, params, mode=None)
  out = jax.block_until_ready(out)

  assert out.shape == (2, 1, 2, 2), out.shape
  assert bool(jnp.all(jnp.isfinite(out)))
  print("KERNEL_OK")
</pallas_src>

<mosaic_0001>
module attributes {stable_mosaic.version = 11 : i64} {
  func.func @kernel(%arg0: i32, %arg1: i32, %arg2: memref<2x16x16x27xbf16, #tpu.memory_space<vmem>>, %arg3: memref<1x1x27x64xbf16, #tpu.memory_space<vmem>>, %arg4: memref<1x64xf32, #tpu.memory_space<vmem>>, %arg5: memref<1x64xf32, #tpu.memory_space<vmem>>, %arg6: memref<2x16x16x64xbf16, #tpu.memory_space<vmem>>, %arg7: memref<512x64xf32, #tpu.memory_space<vmem>>) attributes {dimension_semantics = [#tpu.dimension_semantics<parallel>, #tpu.dimension_semantics<arbitrary>], iteration_bounds = array<i64: 1, 1>, scalar_prefetch = 0 : i64, scratch_operands = 1 : i64, tpu.core_type = #tpu.core_type<tc>, window_params = [{transform_indices = @transform_0, window_bounds = array<i64: 2, 16, 16, 27>}, {transform_indices = @transform_1, window_bounds = array<i64: 1, 1, 27, 64>}, {transform_indices = @transform_2, window_bounds = array<i64: 1, 64>}, {transform_indices = @transform_3, window_bounds = array<i64: 1, 64>}, {transform_indices = @transform_4, window_bounds = array<i64: 2, 16, 16, 64>}]} {
    %c0 = arith.constant 0 : index
    %c0_0 = arith.constant 0 : index
    %c0_1 = arith.constant 0 : index
    %c0_2 = arith.constant 0 : index
    %0 = vector.load %arg2[%c0, %c0_0, %c0_1, %c0_2] : memref<2x16x16x27xbf16, #tpu.memory_space<vmem>>, vector<2x16x16x27xbf16>
    %cst = arith.constant 0.000000e+00 : f32
    %1 = vector.broadcast %cst : f32 to vector<512x64xf32>
    %2 = vector.shape_cast %0 : vector<2x16x16x27xbf16> to vector<512x27xbf16>
    %c0_3 = arith.constant 0 : index
    %c0_4 = arith.constant 0 : index
    %c0_5 = arith.constant 0 : index
    %c0_6 = arith.constant 0 : index
    %3 = vector.load %arg3[%c0_3, %c0_4, %c0_5, %c0_6] : memref<1x1x27x64xbf16, #tpu.memory_space<vmem>>, vector<1x1x27x64xbf16>
    %4 = vector.shape_cast %3 : vector<1x1x27x64xbf16> to vector<27x64xbf16>
    %cst_7 = arith.constant dense<0.000000e+00> : vector<512x64xf32>
    %5 = tpu.matmul %2, %4, %cst_7 {dimension_numbers = #tpu.dot_dimension_numbers<[1], [0], [0], [1], [0, 0, 1, 1], [], []>} : vector<512x27xbf16>, vector<27x64xbf16>, vector<512x64xf32> -> vector<512x64xf32>
    %6 = arith.addf %1, %5 : vector<512x64xf32>
    %c0_i32 = arith.constant 0 : i32
    %7 = arith.cmpi eq, %arg1, %c0_i32 : i32
    %8 = arith.extui %7 : i1 to i32
    %c0_i32_8 = arith.constant 0 : i32
    %9 = arith.cmpi ne, %8, %c0_i32_8 : i32
    scf.if %9 {
      %c0_13 = arith.constant 0 : index
      %c0_14 = arith.constant 0 : index
      %16 = vector.load %arg7[%c0_13, %c0_14] : memref<512x64xf32, #tpu.memory_space<vmem>>, vector<512x64xf32>
      tpu.vector_store %arg7[%c0_13, %c0_14], %6 {strides = array<i32>} : memref<512x64xf32, #tpu.memory_space<vmem>>, vector<512x64xf32>,
    } else {
    }
    %c0_i32_9 = arith.constant 0 : i32
    %10 = arith.cmpi sgt, %arg1, %c0_i32_9 : i32
    %11 = arith.extui %10 : i1 to i32
    %c0_i32_10 = arith.constant 0 : i32
    %12 = arith.cmpi ne, %11, %c0_i32_10 : i32
    scf.if %12 {
      %c0_13 = arith.constant 0 : index
      %c0_14 = arith.constant 0 : index
      %16 = vector.load %arg7[%c0_13, %c0_14] : memref<512x64xf32, #tpu.memory_space<vmem>>, vector<512x64xf32>
      %17 = arith.addf %16, %6 : vector<512x64xf32>
      %c0_15 = arith.constant 0 : index
      %c0_16 = arith.constant 0 : index
      %18 = vector.load %arg7[%c0_15, %c0_16] : memref<512x64xf32, #tpu.memory_space<vmem>>, vector<512x64xf32>
      tpu.vector_store %arg7[%c0_15, %c0_16], %17 {strides = array<i32>} : memref<512x64xf32, #tpu.memory_space<vmem>>, vector<512x64xf32>,
    } else {
    }
    %c0_i32_11 = arith.constant 0 : i32
    %13 = arith.cmpi eq, %arg1, %c0_i32_11 : i32
    %14 = arith.extui %13 : i1 to i32
    %c0_i32_12 = arith.constant 0 : i32
    %15 = arith.cmpi ne, %14, %c0_i32_12 : i32
    scf.if %15 {
      %c0_13 = arith.constant 0 : index
      %c0_14 = arith.constant 0 : index
      %16 = vector.load %arg7[%c0_13, %c0_14] : memref<512x64xf32, #tpu.memory_space<vmem>>, vector<512x64xf32>
      %c0_15 = arith.constant 0 : index
      %c0_16 = arith.constant 0 : index
      %17 = vector.load %arg4[%c0_15, %c0_16] : memref<1x64xf32, #tpu.memory_space<vmem>>, vector<1x64xf32>
      %18 = vector.broadcast %17 : vector<1x64xf32> to vector<512x64xf32>
      %19 = arith.mulf %16, %18 : vector<512x64xf32>
      %c0_17 = arith.constant 0 : index
      %c0_18 = arith.constant 0 : index
      %20 = vector.load %arg5[%c0_17, %c0_18] : memref<1x64xf32, #tpu.memory_space<vmem>>, vector<1x64xf32>
      %21 = vector.broadcast %20 : vector<1x64xf32> to vector<512x64xf32>
      %22 = arith.addf %19, %21 : vector<512x64xf32>
      %cst_19 = arith.constant 0.000000e+00 : f32
      %23 = vector.broadcast %cst_19 : f32 to vector<512x64xf32>
      %24 = arith.maximumf %22, %23 : vector<512x64xf32>
      %25 = vector.shape_cast %24 : vector<512x64xf32> to vector<2x16x16x64xf32>
      %26 = arith.truncf %25 : vector<2x16x16x64xf32> to vector<2x16x16x64xbf16>
      %c0_20 = arith.constant 0 : index
      %c0_21 = arith.constant 0 : index
      %c0_22 = arith.constant 0 : index
      %c0_23 = arith.constant 0 : index
      %27 = vector.load %arg6[%c0_20, %c0_21, %c0_22, %c0_23] : memref<2x16x16x64xbf16, #tpu.memory_space<vmem>>, vector<2x16x16x64xbf16>
      tpu.vector_store %arg6[%c0_20, %c0_21, %c0_22, %c0_23], %26 {strides = array<i32>} : memref<2x16x16x64xbf16, #tpu.memory_space<vmem>>, vector<2x16x16x64xbf16>,
    } else {
    }
    return
  }
  func.func @transform_0(%arg0: i32, %arg1: i32) -> (i32, i32, i32, i32) {
    %c0_i32 = arith.constant 0 : i32
    %c0_i32_0 = arith.constant 0 : i32
    %c0_i32_1 = arith.constant 0 : i32
    %c0_i32_2 = arith.constant 0 : i32
    return %c0_i32, %c0_i32_0, %c0_i32_1, %arg1 : i32, i32, i32, i32
  }
  func.func @transform_1(%arg0: i32, %arg1: i32) -> (i32, i32, i32, i32) {
    %c0_i32 = arith.constant 0 : i32
    %c0_i32_0 = arith.constant 0 : i32
    %c0_i32_1 = arith.constant 0 : i32
    return %c0_i32, %c0_i32_0, %arg1, %arg0 : i32, i32, i32, i32
  }
  func.func @transform_2(%arg0: i32, %arg1: i32) -> (i32, i32) {
    %c0_i32 = arith.constant 0 : i32
    %c0_i32_0 = arith.constant 0 : i32
    return %c0_i32, %arg0 : i32, i32
  }
  func.func @transform_3(%arg0: i32, %arg1: i32) -> (i32, i32) {
    %c0_i32 = arith.constant 0 : i32
    %c0_i32_0 = arith.constant 0 : i32
    return %c0_i32, %arg0 : i32, i32
  }
  func.func @transform_4(%arg0: i32, %arg1: i32) -> (i32, i32, i32, i32) {
    %c0_i32 = arith.constant 0 : i32
    %c0_i32_0 = arith.constant 0 : i32
    %c0_i32_1 = arith.constant 0 : i32
    %c0_i32_2 = arith.constant 0 : i32
    return %c0_i32, %c0_i32_0, %c0_i32_1, %arg0 : i32, i32, i32, i32
  }
}

</mosaic_0001>

<bundles_post_ra>
// kernel: tpu_custom_call.1
= control target key start
LH: loop header
LB: loop body
LE: loop exit
PB: predicated region body
PF: predicated region fallthrough
CT: control target
= control target key end

     0   :  { %9 = vsyncpa [#allocation4], 0  ;;  %s2345_s0 = inlined_call_operand.hbm [shape: bf16[2,16,16,27], index: 0, kind: input, shape index: {}]   ;;  %s2346_s1 = inlined_call_operand.hbm [shape: bf16[1,1,27,64], index: 1, kind: input, shape index: {}]   ;;  %s2347_s2 = inlined_call_operand.vmem [shape: f32[1,64], index: 2, kind: input, shape index: {}]   ;;  %s2348_s3 = inlined_call_operand.vmem [shape: f32[1,64], index: 3, kind: input, shape index: {}]   ;;  %s2349_s4 = inlined_call_operand.hbm [shape: bf16[2,16,16,64], index: 4, kind: output, shape index: {}]  }
   0x1   :  { %10 = vsyncpa [#allocation7], 0 }
   0x2   :  { %11 = vsyncpa [#allocation5], 0  ;;  %s1971_s15 = smov [#allocation3]   ;;  %s1899_s19 = scalar_lea.hbm %s2345_s0, 4096 }
   0x3   :  { %s17_s16 = sshll.u32 %s1971_s15, 4  ;;  %p1900_p0 = scmp.ne.s32.totalorder %s2345_s0, %s1899_s19  ;;  %s18_s16 = int_to_ptr.vmem [resolvable:$true] %s17_s16 }
   0x4   :  { %p1903_p1 = scmp.lt.u32.totalorder %s1899_s19, %s2345_s0 }
   0x6   :  { %p1905_p2 = pnand %p1903_p1, %p1900_p0 }
   0x8   :  { %1908 = shalt.err (!%p1905_p2)
}
   0x9   :  { %s1909_s24 = scalar_lea.vmem %s18_s16, 4096  ;;  %p1914_p4 = scmp.lt.s32.totalorder %s18_s16, %s18_s16 }
   0xa   :  { %p1910_p3 = scmp.ne.s32.totalorder %s18_s16, %s1909_s24  ;;  %p1915_p5 = scmp.lt.s32.totalorder %s1909_s24, %s1909_s24 }
   0xc   :  { %p1916_p6 = por %p1915_p5, %p1914_p4 }
   0xe   :  { %p1917_p7 = pnand %p1916_p6, %p1910_p3 }
  0x10   :  { %1920 = shalt.err (!%p1917_p7)
}
  0x11   :  { %s1972_s25 = smov 64   ;;  %s1973_s26 = smov 4  }
  0x12   :  { %23 = dma.hbm_to_vmem [thread:$0]  %s2345_s0, 4096, %s18_s16, [#allocation4], %s1972_s25, %s1972_s25, %s1973_s26  }
  0x13   :  { %s1974_s29 = smov [#allocation6]   ;;  %s1921_s7 = scalar_lea.hbm %s2346_s1, 256 }
  0x14   :  { %s29_s30 = sshll.u32 %s1974_s29, 4  ;;  %p1922_p8 = scmp.ne.s32.totalorder %s2346_s1, %s1921_s7  ;;  %s30_s30 = int_to_ptr.vmem [resolvable:$true] %s29_s30 }
  0x15   :  { %p1925_p9 = scmp.lt.u32.totalorder %s1921_s7, %s2346_s1 }
  0x17   :  { %p1927_p10 = pnand %p1925_p9, %p1922_p8 }
  0x19   :  { %1930 = shalt.err (!%p1927_p10)
}
  0x1a   :  { %s1931_s12 = scalar_lea.vmem %s30_s30, 256  ;;  %p1936_p12 = scmp.lt.s32.totalorder %s30_s30, %s30_s30 }
  0x1b   :  { %p1932_p11 = scmp.ne.s32.totalorder %s30_s30, %s1931_s12  ;;  %p1937_p13 = scmp.lt.s32.totalorder %s1931_s12, %s1931_s12 }
  0x1d   :  { %p1938_p0 = por %p1937_p13, %p1936_p12 }
  0x1f   :  { %p1939_p1 = pnand %p1938_p0, %p1932_p11 }
  0x21   :  { %1942 = shalt.err (!%p1939_p1)
}
  0x22   :  { %35 = dma.hbm_to_vmem [thread:$0]  %s2346_s1, 256, %s30_s30, [#allocation7], %s1972_s25, %s1972_s25, %s1973_s26  }
  0x23   :  { %1965 = dma.done.wait [#allocation4], 4096  }
  0x24   :  { %1966 = vsyncadd [#allocation4], 4294963200 }
  0x25   :  { %1967 = dma.done.wait [#allocation7], 256  }
  0x26   :  { %1968 = vsyncadd [#allocation7], 4294967040  ;;  %vm383_vm0 = vcmask 1044480   ;;  %vm384_vm1 = vcmask 1045504   ;;  %v1975_v0 = vmov 65535   ;;  %vm286_vm2 = vcmask 220160  }
  0x27   :  { %v385_v1 = vsel %vm383_vm0, 4294967295, %v1975_v0  ;;  %v1865_v2 = vld [vmem:[#allocation6] sm:$0xff]   ;;  %v1866_v4 = vld [vmem:[#allocation6 + $0x8] sm:$0x3f]   ;;  %v1871_v10 = vld [vmem:[#allocation3 + $0x10] sm:$0xff]   ;;  %vm683_vm3 = vcmask 523264  }
  0x28   :  { %v386_v3 = vsel %vm384_vm1, %v385_v1, 0  ;;  %1787 = vmatprep.subr.bf16.mxu0 %v1865_v2  ;;  %1855 = vmatprep.subr.bf16.mxu1 %v1865_v2  ;;  %v1867_v5 = vld [vmem:[#allocation3] sm:$0xff]   ;;  %v1869_v8 = vld [vmem:[#allocation3 + $0x8] sm:$0xff]   ;;  %v1872_v11 = vld [vmem:[#allocation3 + $0x90] sm:$0xff]   ;;  %vm1474_vm4 = vcmask 519168  }
  0x29   :  { %1788 = vmatpush3.bf16.msra.mxu0 %v1865_v2  ;;  %1857 = vmatpush3.bf16.msra.mxu1 %v1865_v2  ;;  %v388_v6 = vand.u32 %v1866_v4, %v386_v3  ;;  %v1868_v7 = vld [vmem:[#allocation3 + $0x80] sm:$0xff]   ;;  %v1870_v9 = vld [vmem:[#allocation3 + $0x88] sm:$0xff]   ;;  %v1873_v12 = vld [vmem:[#allocation3 + $0x18] sm:$0xff]  }
  0x2a   :  { %1791 = vmatprep.mubr.msk.bf16.mxu0 %vm286_vm2, %v1867_v5  ;;  %1823 = vmatprep.mubr.msk.bf16.mxu1 %vm286_vm2, %v1868_v7  ;;  %v1874_v13 = vld [vmem:[#allocation3 + $0x98] sm:$0xff]   ;;  %v1875_v14 = vld [vmem:[#allocation3 + $0x20] sm:$0xff]   ;;  %v1877_v16 = vld [vmem:[#allocation3 + $0x28] sm:$0xff]  }
  0x2b   :  { %1789 = vmatprep.subr.bf16.mxu0 %v388_v6  ;;  %1856 = vmatprep.subr.bf16.mxu1 %v388_v6  ;;  %v1876_v15 = vld [vmem:[#allocation3 + $0xa0] sm:$0xff]   ;;  %v1878_v17 = vld [vmem:[#allocation3 + $0xa8] sm:$0xff]   ;;  %v1879_v18 = vld [vmem:[#allocation3 + $0x30] sm:$0xff]  }
  0x2c   :  { %v1880_v19 = vld [vmem:[#allocation3 + $0xb0] sm:$0xff]   ;;  %v1881_v20 = vld [vmem:[#allocation3 + $0x38] sm:$0xff]   ;;  %v1883_v22 = vld [vmem:[#allocation3 + $0x40] sm:$0xff]  }
  0x2d   :  { %1790 = vmatpush3.bf16.msra.mxu0 %v388_v6  ;;  %1858 = vmatpush3.bf16.msra.mxu1 %v388_v6  ;;  %v1882_v21 = vld [vmem:[#allocation3 + $0xb8] sm:$0xff]   ;;  %v1884_v23 = vld [vmem:[#allocation3 + $0xc0] sm:$0xff]   ;;  %v1885_v24 = vld [vmem:[#allocation3 + $0x48] sm:$0xff]  }
  0x2e   :  { %v1886_v25 = vld [vmem:[#allocation3 + $0xc8] sm:$0xff]   ;;  %v1887_v26 = vld [vmem:[#allocation3 + $0x50] sm:$0xff]   ;;  %v1889_v28 = vld [vmem:[#allocation3 + $0x58] sm:$0xff]  }
  0x2f   :  { %v1888_v27 = vld [vmem:[#allocation3 + $0xd0] sm:$0xff]   ;;  %v1890_v29 = vld [vmem:[#allocation3 + $0xd8] sm:$0xff]   ;;  %v1891_v30 = vld [vmem:[#allocation3 + $0x60] sm:$0xff]  }
  0x30   :  { %1792 = vmatmul.mubr.msk.bf16.vlgmr.msra.gmra.mrb[0].mxu0 %vm286_vm2, %v1869_v8  ;;  %1824 = vmatmul.mubr.msk.bf16.vlgmr.msra.gmra.mrb[0].mxu1 %vm286_vm2, %v1870_v9  ;;  %v1892_v31 = vld [vmem:[#allocation3 + $0xe0] sm:$0xff]   ;;  %v1893_v32 = vld [vmem:[#allocation3 + $0x68] sm:$0xff]   ;;  %v1895_v34 = vld [vmem:[#allocation3 + $0x70] sm:$0xff]  }
  0x31   :  { %1795 = vmatprep.mubr.msk.bf16.mxu0 %vm286_vm2, %v1871_v10  ;;  %1827 = vmatprep.mubr.msk.bf16.mxu1 %vm286_vm2, %v1872_v11  ;;  %v1894_v33 = vld [vmem:[#allocation3 + $0xe8] sm:$0xff]   ;;  %v1896_v35 = vld [vmem:[#allocation3 + $0xf0] sm:$0xff]   ;;  %v1897_v36 = vld [vmem:[#allocation3 + $0x78] sm:$0xff]  }
  0x32   :  { %v1898_v37 = vld [vmem:[#allocation3 + $0xf8] sm:$0xff]   ;;  %v2075_v46 = vld [vmem:[%s2347_s2] ss:$0 sm:$0xff]  ;;  %s1976_s2 = smov [#allocation8]  }
  0x33   :  { %v2080_v48 = vld [vmem:[%s2348_s3] ss:$0 sm:$0xff]  ;;  %s1544_s3 = sshll.u32 %s1976_s2, 4  ;;  %s1545_s3 = int_to_ptr.vmem [resolvable:$true] %s1544_s3 }
  0x34   :  { %s1943_s17 = scalar_lea.vmem %s1545_s3, 4096  ;;  %p1948_p3 = scmp.lt.s32.totalorder %s1545_s3, %s1545_s3 }
  0x35   :  { %p1944_p2 = scmp.ne.s32.totalorder %s1545_s3, %s1943_s17  ;;  %p1949_p4 = scmp.lt.s32.totalorder %s1943_s17, %s1943_s17 }
  0x37   :  { %p1950_p5 = por %p1949_p4, %p1948_p3 }
  0x38   :  { %1796 = vmatmul.mubr.msk.bf16.gmra.mrb[4].mxu0 %vm286_vm2, %v1873_v12  ;;  %1828 = vmatmul.mubr.msk.bf16.gmra.mrb[4].mxu1 %vm286_vm2, %v1874_v13 }
  0x39   :  { %1799 = vmatprep.mubr.msk.bf16.mxu0 %vm286_vm2, %v1875_v14  ;;  %1831 = vmatprep.mubr.msk.bf16.mxu1 %vm286_vm2, %v1876_v15  ;;  %p1951_p6 = pnand %p1950_p5, %p1944_p2 }
  0x40   :  { %1800 = vmatmul.mubr.msk.bf16.gmra.mrb[8].mxu0 %vm286_vm2, %v1877_v16  ;;  %1832 = vmatmul.mubr.msk.bf16.gmra.mrb[8].mxu1 %vm286_vm2, %v1878_v17 }
  0x41   :  { %1803 = vmatprep.mubr.msk.bf16.mxu0 %vm286_vm2, %v1879_v18  ;;  %1835 = vmatprep.mubr.msk.bf16.mxu1 %vm286_vm2, %v1880_v19 }
  0x48   :  { %1804 = vmatmul.mubr.msk.bf16.gmra.mrb[12].mxu0 %vm286_vm2, %v1881_v20  ;;  %1836 = vmatmul.mubr.msk.bf16.gmra.mrb[12].mxu1 %vm286_vm2, %v1882_v21 }
  0x49   :  { %1807 = vmatprep.mubr.msk.bf16.mxu0 %vm286_vm2, %v1883_v22  ;;  %1839 = vmatprep.mubr.msk.bf16.mxu1 %vm286_vm2, %v1884_v23 }
  0x50   :  { %1808 = vmatmul.mubr.msk.bf16.gmra.mrb[16].mxu0 %vm286_vm2, %v1885_v24  ;;  %1840 = vmatmul.mubr.msk.bf16.gmra.mrb[16].mxu1 %vm286_vm2, %v1886_v25 }
  0x51   :  { %1811 = vmatprep.mubr.msk.bf16.mxu0 %vm286_vm2, %v1887_v26  ;;  %1843 = vmatprep.mubr.msk.bf16.mxu1 %vm286_vm2, %v1888_v27 }
  0x58   :  { %1812 = vmatmul.mubr.msk.bf16.gmra.mrb[20].mxu0 %vm286_vm2, %v1889_v28  ;;  %1844 = vmatmul.mubr.msk.bf16.gmra.mrb[20].mxu1 %vm286_vm2, %v1890_v29 }
  0x59   :  { %1815 = vmatprep.mubr.msk.bf16.mxu0 %vm286_vm2, %v1891_v30  ;;  %1847 = vmatprep.mubr.msk.bf16.mxu1 %vm286_vm2, %v1892_v31 }
  0x60   :  { %1816 = vmatmul.mubr.msk.bf16.gmra.mrb[24].mxu0 %vm286_vm2, %v1893_v32  ;;  %1848 = vmatmul.mubr.msk.bf16.gmra.mrb[24].mxu1 %vm286_vm2, %v1894_v33 }
  0x61   :  { %1819 = vmatprep.mubr.msk.bf16.mxu0 %vm286_vm2, %v1895_v34  ;;  %1851 = vmatprep.mubr.msk.bf16.mxu1 %vm286_vm2, %v1896_v35 }
  0x68   :  { %1820 = vmatmul.mubr.msk.bf16.gmra.mrb[28].mxu0 %vm286_vm2, %v1897_v36  ;;  %1852 = vmatmul.mubr.msk.bf16.gmra.mrb[28].mxu1 %vm286_vm2, %v1898_v37 }
 0x103   :  { %v1793_v38 = vpop.f32.mrb[0].mxu0  ;;  %v1825_v39 = vpop.f32.mrb[0].mxu1 }
 0x104   :  { %686 = vst.msk [vmem:[#allocation2 + $0x10] sm:$0xff] %vm683_vm3, %v1793_v38  ;;  %718 = vst.msk [vmem:[#allocation2 + $0x110] sm:$0xff] %vm683_vm3, %v1825_v39  ;;  %v424_v40 = vpop.f32.mrb[1].mxu0  ;;  %v552_v41 = vpop.f32.mrb[1].mxu1 }
 0x105   :  { %684 = vst.msk [vmem:[#allocation2] sm:$0xff] %vm683_vm3, %v424_v40  ;;  %716 = vst.msk [vmem:[#allocation2 + $0x100] sm:$0xff] %vm683_vm3, %v552_v41  ;;  %v1794_v42 = vpop.f32.mrb[2].mxu0  ;;  %v1826_v43 = vpop.f32.mrb[2].mxu1 }
 0x106   :  { %687 = vst.msk [vmem:[#allocation2 + $0x18] sm:$0xff] %vm683_vm3, %v1794_v42  ;;  %719 = vst.msk [vmem:[#allocation2 + $0x118] sm:$0xff] %vm683_vm3, %v1826_v43  ;;  %v427_v44 = vpop.f32.mrb[3].mxu0  ;;  %v555_v45 = vpop.f32.mrb[3].mxu1 }
 0x107   :  { %685 = vst.msk [vmem:[#allocation2 + $0x8] sm:$0xff] %vm683_vm3, %v427_v44  ;;  %717 = vst.msk [vmem:[#allocation2 + $0x108] sm:$0xff] %vm683_vm3, %v555_v45 }
 0x10b   :  { %v950_v47 = vld [vmem:[#allocation2 + $0x10] sm:$0xff]  ;;  %v1797_v50 = vpop.f32.mrb[4].mxu0  ;;  %v1829_v51 = vpop.f32.mrb[4].mxu1 }
 0x10c   :  { %v982_v49 = vld [vmem:[#allocation2 + $0x110] sm:$0xff]  ;;  %v1021_v52 = vmul.f32 %v2075_v46, %v950_v47  ;;  %v948_v54 = vld [vmem:[#allocation2] sm:$0xff]  ;;  %690 = vst.msk [vmem:[#allocation2 + $0x30] sm:$0xff] %vm683_vm3, %v1797_v50  ;;  %722 = vst.msk [vmem:[#allocation2 + $0x130] sm:$0xff] %vm683_vm3, %v1829_v51  ;;  %v440_v56 = vpop.f32.mrb[5].mxu0  ;;  %v568_v57 = vpop.f32.mrb[5].mxu1 }
 0x10d   :  { %v1053_v53 = vmul.f32 %v2075_v46, %v982_v49  ;;  %v980_v55 = vld [vmem:[#allocation2 + $0x100] sm:$0xff]  ;;  %v1019_v58 = vmul.f32 %v2075_v46, %v948_v54  ;;  %v951_v60 = vld [vmem:[#allocation2 + $0x18] sm:$0xff]  ;;  %688 = vst.msk [vmem:[#allocation2 + $0x20] sm:$0xff] %vm683_vm3, %v440_v56  ;;  %720 = vst.msk [vmem:[#allocation2 + $0x120] sm:$0xff] %vm683_vm3, %v568_v57  ;;  %v1798_v62 = vpop.f32.mrb[6].mxu0  ;;  %v1830_v63 = vpop.f32.mrb[6].mxu1 }
 0x10e   :  { %v1051_v59 = vmul.f32 %v2075_v46, %v980_v55  ;;  %v983_v61 = vld [vmem:[#allocation2 + $0x118] sm:$0xff]  ;;  %v1092_v0 = vadd.f32 %v2080_v48, %v1021_v52  ;;  %v1022_v2 = vmul.f32 %v2075_v46, %v951_v60  ;;  %v949_v4 = vld [vmem:[#allocation2 + $0x8] sm:$0xff]  ;;  %691 = vst.msk [vmem:[#allocation2 + $0x38] sm:$0xff] %vm683_vm3, %v1798_v62  ;;  %723 = vst.msk [vmem:[#allocation2 + $0x138] sm:$0xff] %vm683_vm3, %v1830_v63  ;;  %v443_v6 = vpop.f32.mrb[7].mxu0  ;;  %v571_v7 = vpop.f32.mrb[7].mxu1 }
 0x10f   :  { %v1124_v1 = vadd.f32 %v2080_v48, %v1053_v53  ;;  %v1054_v3 = vmul.f32 %v2075_v46, %v983_v61  ;;  %v981_v5 = vld [vmem:[#allocation2 + $0x108] sm:$0xff]  ;;  %v1090_v8 = vadd.f32 %v2080_v48, %v1019_v58  ;;  %v1020_v10 = vmul.f32 %v2075_v46, %v949_v4  ;;  %689 = vst.msk [vmem:[#allocation2 + $0x28] sm:$0xff] %vm683_vm3, %v443_v6 }
 0x110   :  { %v1122_v9 = vadd.f32 %v2080_v48, %v1051_v59  ;;  %v1052_v11 = vmul.f32 %v2075_v46, %v981_v5  ;;  %721 = vst.msk [vmem:[#allocation2 + $0x128] sm:$0xff] %vm683_vm3, %v571_v7  ;;  %v1156_v12 = vmax.f32 %v1092_v0, 0.0  ;;  %v1093_v14 = vadd.f32 %v2080_v48, %v1022_v2 }
 0x111   :  { %v1188_v13 = vmax.f32 %v1124_v1, 0.0  ;;  %v1125_v15 = vadd.f32 %v2080_v48, %v1054_v3  ;;  %v1154_v16 = vmax.f32 %v1090_v8, 0.0  ;;  %v1091_v18 = vadd.f32 %v2080_v48, %v1020_v10 }
 0x112   :  { %v1186_v17 = vmax.f32 %v1122_v9, 0.0  ;;  %v1123_v19 = vadd.f32 %v2080_v48, %v1052_v11  ;;  %v1691_v20 = vpack.c.bf16 %v1156_v12, %v1156_v12  ;;  %v1157_v22 = vmax.f32 %v1093_v14, 0.0 }
 0x113   :  { %v1723_v21 = vpack.c.bf16 %v1188_v13, %v1188_v13  ;;  %v1189_v23 = vmax.f32 %v1125_v15, 0.0  ;;  %v1689_v24 = vpack.c.bf16 %v1154_v16, %v1154_v16  ;;  %v1155_v26 = vmax.f32 %v1091_v18, 0.0  ;;  %v954_v28 = vld [vmem:[#allocation2 + $0x30] sm:$0xff]  ;;  %v1801_v30 = vpop.f32.mrb[8].mxu0  ;;  %v1833_v31 = vpop.f32.mrb[8].mxu1 }
 0x114   :  { %v1721_v25 = vpack.c.bf16 %v1186_v17, %v1186_v17  ;;  %v1187_v27 = vmax.f32 %v1123_v19, 0.0  ;;  %v986_v29 = vld [vmem:[#allocation2 + $0x130] sm:$0xff]  ;;  %1477 = vst.msk [vmem:[#allocation8 + $0x8] sm:$0xf] %vm1474_vm4, %v1691_v20  ;;  %v1692_v32 = vpack.c.bf16 %v1157_v22, %v1157_v22  ;;  %v1025_v34 = vmul.f32 %v2075_v46, %v954_v28  ;;  %v952_v36 = vld [vmem:[#allocation2 + $0x20] sm:$0xff]  ;;  %v456_v38 = vpop.f32.mrb[9].mxu0 }
 0x115   :  { %1509 = vst.msk [vmem:[#allocation8 + $0x88] sm:$0xf] %vm1474_vm4, %v1723_v21  ;;  %v1724_v33 = vpack.c.bf16 %v1189_v23, %v1189_v23  ;;  %v1057_v35 = vmul.f32 %v2075_v46, %v986_v29  ;;  %v984_v37 = vld [vmem:[#allocation2 + $0x120] sm:$0xff]  ;;  %v584_v39 = vpop.f32.mrb[9].mxu1  ;;  %1475 = vst.msk [vmem:[#allocation8] sm:$0xf] %vm1474_vm4, %v1689_v24  ;;  %v1690_v40 = vpack.c.bf16 %v1155_v26, %v1155_v26 }
 0x116   :  { %694 = vst.msk [vmem:[#allocation2 + $0x50] sm:$0xff] %vm683_vm3, %v1801_v30  ;;  %726 = vst.msk [vmem:[#allocation2 + $0x150] sm:$0xff] %vm683_vm3, %v1833_v31  ;;  %v1722_v41 = vpack.c.bf16 %v1187_v27, %v1187_v27  ;;  %v1023_v42 = vmul.f32 %v2075_v46, %v952_v36  ;;  %v1055_v43 = vmul.f32 %v2075_v46, %v984_v37  ;;  %v955_v44 = vld [vmem:[#allocation2 + $0x38] sm:$0xff]  ;;  %v1802_v47 = vpop.f32.mrb[10].mxu0  ;;  %v1834_v49 = vpop.f32.mrb[10].mxu1  ;;  %v953_v54 = vld [vmem:[#allocation2 + $0x28] sm:$0xff] }
 0x117   :  { %1507 = vst.msk [vmem:[#allocation8 + $0x80] sm:$0xf] %vm1474_vm4, %v1721_v25  ;;  %v987_v45 = vld [vmem:[#allocation2 + $0x138] sm:$0xff]  ;;  %1478 = vst.msk [vmem:[#allocation8 + $0xc] sm:$0xf] %vm1474_vm4, %v1692_v32  ;;  %v1096_v50 = vadd.f32 %v2080_v48, %v1025_v34  ;;  %v1128_v51 = vadd.f32 %v2080_v48, %v1057_v35  ;;  %v1026_v52 = vmul.f32 %v2075_v46, %v955_v44  ;;  %v985_v55 = vld [vmem:[#allocation2 + $0x128] sm:$0xff] }
 0x118   :  { %692 = vst.msk [vmem:[#allocation2 + $0x40] sm:$0xff] %vm683_vm3, %v456_v38  ;;  %724 = vst.msk [vmem:[#allocation2 + $0x140] sm:$0xff] %vm683_vm3, %v584_v39  ;;  %v1058_v53 = vmul.f32 %v2075_v46, %v987_v45  ;;  %v459_v56 = vpop.f32.mrb[11].mxu0  ;;  %v587_v57 = vpop.f32.mrb[11].mxu1  ;;  %v1094_v58 = vadd.f32 %v2080_v48, %v1023_v42  ;;  %v1126_v59 = vadd.f32 %v2080_v48, %v1055_v43 }
 0x119   :  { %1510 = vst.msk [vmem:[#allocation8 + $0x8c] sm:$0xf] %vm1474_vm4, %v1724_v33  ;;  %1476 = vst.msk [vmem:[#allocation8 + $0x4] sm:$0xf] %vm1474_vm4, %v1690_v40  ;;  %v1024_v60 = vmul.f32 %v2075_v46, %v953_v54  ;;  %v1056_v61 = vmul.f32 %v2075_v46, %v985_v55  ;;  %v1160_v62 = vmax.f32 %v1096_v50, 0.0  ;;  %v1192_v63 = vmax.f32 %v1128_v51, 0.0 }
 0x11a   :  { %695 = vst.msk [vmem:[#allocation2 + $0x58] sm:$0xff] %vm683_vm3, %v1802_v47  ;;  %727 = vst.msk [vmem:[#allocation2 + $0x158] sm:$0xff] %vm683_vm3, %v1834_v49  ;;  %v1097_v0 = vadd.f32 %v2080_v48, %v1026_v52  ;;  %v1129_v1 = vadd.f32 %v2080_v48, %v1058_v53  ;;  %v1158_v2 = vmax.f32 %v1094_v58, 0.0  ;;  %v1190_v3 = vmax.f32 %v1126_v59, 0.0 }
 0x11b   :  { %1508 = vst.msk [vmem:[#allocation8 + $0x84] sm:$0xf] %vm1474_vm4, %v1722_v41  ;;  %v1095_v4 = vadd.f32 %v2080_v48, %v1024_v60  ;;  %v1127_v5 = vadd.f32 %v2080_v48, %v1056_v61  ;;  %v1695_v6 = vpack.c.bf16 %v1160_v62, %v1160_v62  ;;  %v1727_v7 = vpack.c.bf16 %v1192_v63, %v1192_v63  ;;  %v1805_v16 = vpop.f32.mrb[12].mxu0  ;;  %v1837_v17 = vpop.f32.mrb[12].mxu1 }
 0x11c   :  { %693 = vst.msk [vmem:[#allocation2 + $0x48] sm:$0xff] %vm683_vm3, %v459_v56  ;;  %725 = vst.msk [vmem:[#allocation2 + $0x148] sm:$0xff] %vm683_vm3, %v587_v57  ;;  %v1161_v8 = vmax.f32 %v1097_v0, 0.0  ;;  %v1193_v9 = vmax.f32 %v1129_v1, 0.0  ;;  %v1693_v10 = vpack.c.bf16 %v1158_v2, %v1158_v2  ;;  %v1725_v11 = vpack.c.bf16 %v1190_v3, %v1190_v3  ;;  %v472_v24 = vpop.f32.mrb[13].mxu0  ;;  %v600_v25 = vpop.f32.mrb[13].mxu1 }
 0x11d   :  { %v1159_v12 = vmax.f32 %v1095_v4, 0.0  ;;  %v1191_v13 = vmax.f32 %v1127_v5, 0.0  ;;  %v958_v14 = vld [vmem:[#allocation2 + $0x50] sm:$0xff]  ;;  %1481 = vst.msk [vmem:[#allocation8 + $0x18] sm:$0xf] %vm1474_vm4, %v1695_v6  ;;  %v1806_v32 = vpop.f32.mrb[14].mxu0 }
 0x11e   :  { %v990_v15 = vld [vmem:[#allocation2 + $0x150] sm:$0xff]  ;;  %1513 = vst.msk [vmem:[#allocation8 + $0x98] sm:$0xf] %vm1474_vm4, %v1727_v7  ;;  %v1696_v18 = vpack.c.bf16 %v1161_v8, %v1161_v8  ;;  %v1728_v19 = vpack.c.bf16 %v1193_v9, %v1193_v9  ;;  %v1029_v20 = vmul.f32 %v2075_v46, %v958_v14  ;;  %1479 = vst.msk [vmem:[#allocation8 + $0x10] sm:$0xf] %vm1474_vm4, %v1693_v10  ;;  %v1838_v33 = vpop.f32.mrb[14].mxu1 }
 0x11f   :  { %v1061_v21 = vmul.f32 %v2075_v46, %v990_v15  ;;  %v956_v22 = vld [vmem:[#allocation2 + $0x40] sm:$0xff]  ;;  %698 = vst.msk [vmem:[#allocation2 + $0x70] sm:$0xff] %vm683_vm3, %v1805_v16  ;;  %730 = vst.msk [vmem:[#allocation2 + $0x170] sm:$0xff] %vm683_vm3, %v1837_v17  ;;  %v1694_v26 = vpack.c.bf16 %v1159_v12, %v1159_v12  ;;  %v1726_v27 = vpack.c.bf16 %v1191_v13, %v1191_v13  ;;  %v475_v40 = vpop.f32.mrb[15].mxu0  ;;  %v603_v41 = vpop.f32.mrb[15].mxu1 }
 0x120   :  { %v988_v23 = vld [vmem:[#allocation2 + $0x140] sm:$0xff]  ;;  %1511 = vst.msk [vmem:[#allocation8 + $0x90] sm:$0xf] %vm1474_vm4, %v1725_v11  ;;  %v1027_v28 = vmul.f32 %v2075_v46, %v956_v22  ;;  %1482 = vst.msk [vmem:[#allocation8 + $0x1c] sm:$0xf] %vm1474_vm4, %v1696_v18  ;;  %v1100_v34 = vadd.f32 %v2080_v48, %v1029_v20 }
 0x121   :  { %v1059_v29 = vmul.f32 %v2075_v46, %v988_v23  ;;  %v959_v30 = vld [vmem:[#allocation2 + $0x58] sm:$0xff]  ;;  %696 = vst.msk [vmem:[#allocation2 + $0x60] sm:$0xff] %vm683_vm3, %v472_v24  ;;  %728 = vst.msk [vmem:[#allocation2 + $0x160] sm:$0xff] %vm683_vm3, %v600_v25  ;;  %v1132_v35 = vadd.f32 %v2080_v48, %v1061_v21 }
 0x122   :  { %v991_v31 = vld [vmem:[#allocation2 + $0x158] sm:$0xff]  ;;  %1514 = vst.msk [vmem:[#allocation8 + $0x9c] sm:$0xf] %vm1474_vm4, %v1728_v19  ;;  %v1030_v36 = vmul.f32 %v2075_v46, %v959_v30  ;;  %1480 = vst.msk [vmem:[#allocation8 + $0x14] sm:$0xf] %vm1474_vm4, %v1694_v26  ;;  %v1098_v42 = vadd.f32 %v2080_v48, %v1027_v28  ;;  %v1164_v47 = vmax.f32 %v1100_v34, 0.0 }
 0x123   :  { %v1062_v37 = vmul.f32 %v2075_v46, %v991_v31  ;;  %v957_v38 = vld [vmem:[#allocation2 + $0x48] sm:$0xff]  ;;  %699 = vst.msk [vmem:[#allocation2 + $0x78] sm:$0xff] %vm683_vm3, %v1806_v32  ;;  %731 = vst.msk [vmem:[#allocation2 + $0x178] sm:$0xff] %vm683_vm3, %v1838_v33  ;;  %v1130_v43 = vadd.f32 %v2080_v48, %v1059_v29  ;;  %v1196_v49 = vmax.f32 %v1132_v35, 0.0  ;;  %v1809_v2 = vpop.f32.mrb[16].mxu0  ;;  %v1841_v3 = vpop.f32.mrb[16].mxu1 }
 0x124   :  { %v989_v39 = vld [vmem:[#allocation2 + $0x148] sm:$0xff]  ;;  %1512 = vst.msk [vmem:[#allocation8 + $0x94] sm:$0xf] %vm1474_vm4, %v1726_v27  ;;  %v1028_v44 = vmul.f32 %v2075_v46, %v957_v38  ;;  %v1101_v50 = vadd.f32 %v2080_v48, %v1030_v36  ;;  %v1162_v52 = vmax.f32 %v1098_v42, 0.0  ;;  %v1699_v56 = vpack.c.bf16 %v1164_v47, %v1164_v47  ;;  %v488_v10 = vpop.f32.mrb[17].mxu0  ;;  %v616_v11 = vpop.f32.mrb[17].mxu1 }
 0x125   :  { %v1060_v45 = vmul.f32 %v2075_v46, %v989_v39  ;;  %697 = vst.msk [vmem:[#allocation2 + $0x68] sm:$0xff] %vm683_vm3, %v475_v40  ;;  %729 = vst.msk [vmem:[#allocation2 + $0x168] sm:$0xff] %vm683_vm3, %v603_v41  ;;  %v1133_v51 = vadd.f32 %v2080_v48, %v1062_v37  ;;  %v1194_v53 = vmax.f32 %v1130_v43, 0.0  ;;  %v1731_v57 = vpack.c.bf16 %v1196_v49, %v1196_v49  ;;  %v1810_v18 = vpop.f32.mrb[18].mxu0  ;;  %v1842_v19 = vpop.f32.mrb[18].mxu1 }
 0x126   :  { %v1099_v54 = vadd.f32 %v2080_v48, %v1028_v44  ;;  %v1165_v58 = vmax.f32 %v1101_v50, 0.0  ;;  %v1697_v60 = vpack.c.bf16 %v1162_v52, %v1162_v52  ;;  %v962_v0 = vld [vmem:[#allocation2 + $0x70] sm:$0xff]  ;;  %1485 = vst.msk [vmem:[#allocation8 + $0x28] sm:$0xf] %vm1474_vm4, %v1699_v56  ;;  %v491_v26 = vpop.f32.mrb[19].mxu0  ;;  %v619_v27 = vpop.f32.mrb[19].mxu1 }
 0x127   :  { %v1131_v55 = vadd.f32 %v2080_v48, %v1060_v45  ;;  %v1197_v59 = vmax.f32 %v1133_v51, 0.0  ;;  %v1729_v61 = vpack.c.bf16 %v1194_v53, %v1194_v53  ;;  %v994_v1 = vld [vmem:[#allocation2 + $0x170] sm:$0xff]  ;;  %1517 = vst.msk [vmem:[#allocation8 + $0xa8] sm:$0xf] %vm1474_vm4, %v1731_v57  ;;  %v1033_v6 = vmul.f32 %v2075_v46, %v962_v0 }
 0x128   :  { %v1163_v62 = vmax.f32 %v1099_v54, 0.0  ;;  %v1700_v4 = vpack.c.bf16 %v1165_v58, %v1165_v58  ;;  %v1065_v7 = vmul.f32 %v2075_v46, %v994_v1  ;;  %v960_v8 = vld [vmem:[#allocation2 + $0x60] sm:$0xff]  ;;  %702 = vst.msk [vmem:[#allocation2 + $0x90] sm:$0xff] %vm683_vm3, %v1809_v2  ;;  %734 = vst.msk [vmem:[#allocation2 + $0x190] sm:$0xff] %vm683_vm3, %v1841_v3 }
 0x129   :  { %v1195_v63 = vmax.f32 %v1131_v55, 0.0  ;;  %v1732_v5 = vpack.c.bf16 %v1197_v59, %v1197_v59  ;;  %v992_v9 = vld [vmem:[#allocation2 + $0x160] sm:$0xff]  ;;  %1483 = vst.msk [vmem:[#allocation8 + $0x20] sm:$0xf] %vm1474_vm4, %v1697_v60  ;;  %1515 = vst.msk [vmem:[#allocation8 + $0xa0] sm:$0xf] %vm1474_vm4, %v1729_v61  ;;  %v1031_v14 = vmul.f32 %v2075_v46, %v960_v8  ;;  %v1104_v20 = vadd.f32 %v2080_v48, %v1033_v6 }
 0x12a   :  { %v1698_v12 = vpack.c.bf16 %v1163_v62, %v1163_v62  ;;  %v1063_v15 = vmul.f32 %v2075_v46, %v992_v9  ;;  %v963_v16 = vld [vmem:[#allocation2 + $0x78] sm:$0xff]  ;;  %700 = vst.msk [vmem:[#allocation2 + $0x80] sm:$0xff] %vm683_vm3, %v488_v10  ;;  %732 = vst.msk [vmem:[#allocation2 + $0x180] sm:$0xff] %vm683_vm3, %v616_v11  ;;  %v1136_v21 = vadd.f32 %v2080_v48, %v1065_v7 }
 0x12b   :  { %v1730_v13 = vpack.c.bf16 %v1195_v63, %v1195_v63  ;;  %v995_v17 = vld [vmem:[#allocation2 + $0x178] sm:$0xff]  ;;  %1486 = vst.msk [vmem:[#allocation8 + $0x2c] sm:$0xf] %vm1474_vm4, %v1700_v4  ;;  %1518 = vst.msk [vmem:[#allocation8 + $0xac] sm:$0xf] %vm1474_vm4, %v1732_v5  ;;  %v1034_v22 = vmul.f32 %v2075_v46, %v963_v16  ;;  %v1102_v28 = vadd.f32 %v2080_v48, %v1031_v14  ;;  %v1168_v32 = vmax.f32 %v1104_v20, 0.0 }
 0x12c   :  { %v1066_v23 = vmul.f32 %v2075_v46, %v995_v17  ;;  %v961_v24 = vld [vmem:[#allocation2 + $0x68] sm:$0xff]  ;;  %703 = vst.msk [vmem:[#allocation2 + $0x98] sm:$0xff] %vm683_vm3, %v1810_v18  ;;  %735 = vst.msk [vmem:[#allocation2 + $0x198] sm:$0xff] %vm683_vm3, %v1842_v19  ;;  %v1134_v29 = vadd.f32 %v2080_v48, %v1063_v15  ;;  %v1200_v33 = vmax.f32 %v1136_v21, 0.0  ;;  %v1813_v52 = vpop.f32.mrb[20].mxu0  ;;  %v1845_v53 = vpop.f32.mrb[20].mxu1 }
 0x12d   :  { %v993_v25 = vld [vmem:[#allocation2 + $0x168] sm:$0xff]  ;;  %1484 = vst.msk [vmem:[#allocation8 + $0x24] sm:$0xf] %vm1474_vm4, %v1698_v12  ;;  %1516 = vst.msk [vmem:[#allocation8 + $0xa4] sm:$0xf] %vm1474_vm4, %v1730_v13  ;;  %v1032_v30 = vmul.f32 %v2075_v46, %v961_v24  ;;  %v1105_v34 = vadd.f32 %v2080_v48, %v1034_v22  ;;  %v1166_v36 = vmax.f32 %v1102_v28, 0.0  ;;  %v1703_v40 = vpack.c.bf16 %v1168_v32, %v1168_v32 }
 0x12e   :  { %v1064_v31 = vmul.f32 %v2075_v46, %v993_v25  ;;  %701 = vst.msk [vmem:[#allocation2 + $0x88] sm:$0xff] %vm683_vm3, %v491_v26  ;;  %733 = vst.msk [vmem:[#allocation2 + $0x188] sm:$0xff] %vm683_vm3, %v619_v27  ;;  %v1137_v35 = vadd.f32 %v2080_v48, %v1066_v23  ;;  %v1198_v37 = vmax.f32 %v1134_v29, 0.0  ;;  %v1735_v41 = vpack.c.bf16 %v1200_v33, %v1200_v33  ;;  %v504_v60 = vpop.f32.mrb[21].mxu0  ;;  %v632_v61 = vpop.f32.mrb[21].mxu1 }
 0x12f   :  { %v1103_v38 = vadd.f32 %v2080_v48, %v1032_v30  ;;  %v1169_v42 = vmax.f32 %v1105_v34, 0.0  ;;  %v1701_v44 = vpack.c.bf16 %v1166_v36, %v1166_v36  ;;  %v966_v50 = vld [vmem:[#allocation2 + $0x90] sm:$0xff]  ;;  %1489 = vst.msk [vmem:[#allocation8 + $0x38] sm:$0xf] %vm1474_vm4, %v1703_v40  ;;  %v1814_v4 = vpop.f32.mrb[22].mxu0  ;;  %v1846_v5 = vpop.f32.mrb[22].mxu1 }
 0x130   :  { %v1135_v39 = vadd.f32 %v2080_v48, %v1064_v31  ;;  %v1201_v43 = vmax.f32 %v1137_v35, 0.0  ;;  %v1733_v45 = vpack.c.bf16 %v1198_v37, %v1198_v37  ;;  %v998_v51 = vld [vmem:[#allocation2 + $0x190] sm:$0xff]  ;;  %1521 = vst.msk [vmem:[#allocation8 + $0xb8] sm:$0xf] %vm1474_vm4, %v1735_v41  ;;  %v1037_v56 = vmul.f32 %v2075_v46, %v966_v50  ;;  %v507_v12 = vpop.f32.mrb[23].mxu0  ;;  %v635_v13 = vpop.f32.mrb[23].mxu1 }
 0x131   :  { %v1167_v47 = vmax.f32 %v1103_v38, 0.0  ;;  %v1704_v54 = vpack.c.bf16 %v1169_v42, %v1169_v42  ;;  %v1069_v57 = vmul.f32 %v2075_v46, %v998_v51  ;;  %v964_v58 = vld [vmem:[#allocation2 + $0x80] sm:$0xff]  ;;  %706 = vst.msk [vmem:[#allocation2 + $0xb0] sm:$0xff] %vm683_vm3, %v1813_v52  ;;  %738 = vst.msk [vmem:[#allocation2 + $0x1b0] sm:$0xff] %vm683_vm3, %v1845_v53 }
 0x132   :  { %v1199_v49 = vmax.f32 %v1135_v39, 0.0  ;;  %v1736_v55 = vpack.c.bf16 %v1201_v43, %v1201_v43  ;;  %v996_v59 = vld [vmem:[#allocation2 + $0x180] sm:$0xff]  ;;  %1487 = vst.msk [vmem:[#allocation8 + $0x30] sm:$0xf] %vm1474_vm4, %v1701_v44  ;;  %1519 = vst.msk [vmem:[#allocation8 + $0xb0] sm:$0xf] %vm1474_vm4, %v1733_v45  ;;  %v1035_v0 = vmul.f32 %v2075_v46, %v964_v58  ;;  %v1108_v6 = vadd.f32 %v2080_v48, %v1037_v56 }
 0x133   :  { %v1702_v62 = vpack.c.bf16 %v1167_v47, %v1167_v47  ;;  %v1067_v1 = vmul.f32 %v2075_v46, %v996_v59  ;;  %v967_v2 = vld [vmem:[#allocation2 + $0x98] sm:$0xff]  ;;  %704 = vst.msk [vmem:[#allocation2 + $0xa0] sm:$0xff] %vm683_vm3, %v504_v60  ;;  %736 = vst.msk [vmem:[#allocation2 + $0x1a0] sm:$0xff] %vm683_vm3, %v632_v61  ;;  %v1140_v7 = vadd.f32 %v2080_v48, %v1069_v57  ;;  %v1817_v36 = vpop.f32.mrb[24].mxu0  ;;  %v1849_v37 = vpop.f32.mrb[24].mxu1 }
 0x134   :  { %v1734_v63 = vpack.c.bf16 %v1199_v49, %v1199_v49  ;;  %v999_v3 = vld [vmem:[#allocation2 + $0x198] sm:$0xff]  ;;  %1490 = vst.msk [vmem:[#allocation8 + $0x3c] sm:$0xf] %vm1474_vm4, %v1704_v54  ;;  %1522 = vst.msk [vmem:[#allocation8 + $0xbc] sm:$0xf] %vm1474_vm4, %v1736_v55  ;;  %v1038_v8 = vmul.f32 %v2075_v46, %v967_v2  ;;  %v1106_v14 = vadd.f32 %v2080_v48, %v1035_v0  ;;  %v1172_v18 = vmax.f32 %v1108_v6, 0.0 }
 0x135   :  { %v1070_v9 = vmul.f32 %v2075_v46, %v999_v3  ;;  %v965_v10 = vld [vmem:[#allocation2 + $0x88] sm:$0xff]  ;;  %707 = vst.msk [vmem:[#allocation2 + $0xb8] sm:$0xff] %vm683_vm3, %v1814_v4  ;;  %739 = vst.msk [vmem:[#allocation2 + $0x1b8] sm:$0xff] %vm683_vm3, %v1846_v5  ;;  %v1138_v15 = vadd.f32 %v2080_v48, %v1067_v1  ;;  %v1204_v19 = vmax.f32 %v1140_v7, 0.0  ;;  %v520_v44 = vpop.f32.mrb[25].mxu0  ;;  %v648_v45 = vpop.f32.mrb[25].mxu1 }
 0x136   :  { %v997_v11 = vld [vmem:[#allocation2 + $0x188] sm:$0xff]  ;;  %1488 = vst.msk [vmem:[#allocation8 + $0x34] sm:$0xf] %vm1474_vm4, %v1702_v62  ;;  %1520 = vst.msk [vmem:[#allocation8 + $0xb4] sm:$0xf] %vm1474_vm4, %v1734_v63  ;;  %v1036_v16 = vmul.f32 %v2075_v46, %v965_v10  ;;  %v1109_v20 = vadd.f32 %v2080_v48, %v1038_v8  ;;  %v1170_v22 = vmax.f32 %v1106_v14, 0.0  ;;  %v1707_v26 = vpack.c.bf16 %v1172_v18, %v1172_v18 }
 0x137   :  { %v1068_v17 = vmul.f32 %v2075_v46, %v997_v11  ;;  %705 = vst.msk [vmem:[#allocation2 + $0xa8] sm:$0xff] %vm683_vm3, %v507_v12  ;;  %737 = vst.msk [vmem:[#allocation2 + $0x1a8] sm:$0xff] %vm683_vm3, %v635_v13  ;;  %v1141_v21 = vadd.f32 %v2080_v48, %v1070_v9  ;;  %v1202_v23 = vmax.f32 %v1138_v15, 0.0  ;;  %v1739_v27 = vpack.c.bf16 %v1204_v19, %v1204_v19  ;;  %v1818_v54 = vpop.f32.mrb[26].mxu0  ;;  %v1850_v55 = vpop.f32.mrb[26].mxu1 }
 0x138   :  { %v1107_v24 = vadd.f32 %v2080_v48, %v1036_v16  ;;  %v1173_v28 = vmax.f32 %v1109_v20, 0.0  ;;  %v1705_v30 = vpack.c.bf16 %v1170_v22, %v1170_v22  ;;  %v970_v34 = vld [vmem:[#allocation2 + $0xb0] sm:$0xff]  ;;  %1493 = vst.msk [vmem:[#allocation8 + $0x48] sm:$0xf] %vm1474_vm4, %v1707_v26  ;;  %v523_v62 = vpop.f32.mrb[27].mxu0  ;;  %v651_v63 = vpop.f32.mrb[27].mxu1 }
 0x139   :  { %v1139_v25 = vadd.f32 %v2080_v48, %v1068_v17  ;;  %v1205_v29 = vmax.f32 %v1141_v21, 0.0  ;;  %v1737_v31 = vpack.c.bf16 %v1202_v23, %v1202_v23  ;;  %v1002_v35 = vld [vmem:[#allocation2 + $0x1b0] sm:$0xff]  ;;  %1525 = vst.msk [vmem:[#allocation8 + $0xc8] sm:$0xf] %vm1474_vm4, %v1739_v27  ;;  %v1041_v40 = vmul.f32 %v2075_v46, %v970_v34 }
 0x13a   :  { %v1171_v32 = vmax.f32 %v1107_v24, 0.0  ;;  %v1708_v38 = vpack.c.bf16 %v1173_v28, %v1173_v28  ;;  %v1073_v41 = vmul.f32 %v2075_v46, %v1002_v35  ;;  %v968_v42 = vld [vmem:[#allocation2 + $0xa0] sm:$0xff]  ;;  %710 = vst.msk [vmem:[#allocation2 + $0xd0] sm:$0xff] %vm683_vm3, %v1817_v36  ;;  %742 = vst.msk [vmem:[#allocation2 + $0x1d0] sm:$0xff] %vm683_vm3, %v1849_v37 }
 0x13b   :  { %v1203_v33 = vmax.f32 %v1139_v25, 0.0  ;;  %v1740_v39 = vpack.c.bf16 %v1205_v29, %v1205_v29  ;;  %v1000_v43 = vld [vmem:[#allocation2 + $0x1a0] sm:$0xff]  ;;  %1491 = vst.msk [vmem:[#allocation8 + $0x40] sm:$0xf] %vm1474_vm4, %v1705_v30  ;;  %1523 = vst.msk [vmem:[#allocation8 + $0xc0] sm:$0xf] %vm1474_vm4, %v1737_v31  ;;  %v1039_v50 = vmul.f32 %v2075_v46, %v968_v42  ;;  %v1112_v56 = vadd.f32 %v2080_v48, %v1041_v40 }
 0x13c   :  { %v1706_v47 = vpack.c.bf16 %v1171_v32, %v1171_v32  ;;  %v1071_v51 = vmul.f32 %v2075_v46, %v1000_v43  ;;  %v971_v52 = vld [vmem:[#allocation2 + $0xb8] sm:$0xff]  ;;  %708 = vst.msk [vmem:[#allocation2 + $0xc0] sm:$0xff] %vm683_vm3, %v520_v44  ;;  %740 = vst.msk [vmem:[#allocation2 + $0x1c0] sm:$0xff] %vm683_vm3, %v648_v45  ;;  %v1144_v57 = vadd.f32 %v2080_v48, %v1073_v41  ;;  %v1821_v22 = vpop.f32.mrb[28].mxu0  ;;  %v1853_v23 = vpop.f32.mrb[28].mxu1 }
 0x13d   :  { %v1738_v49 = vpack.c.bf16 %v1203_v33, %v1203_v33  ;;  %v1003_v53 = vld [vmem:[#allocation2 + $0x1b8] sm:$0xff]  ;;  %1494 = vst.msk [vmem:[#allocation8 + $0x4c] sm:$0xf] %vm1474_vm4, %v1708_v38  ;;  %1526 = vst.msk [vmem:[#allocation8 + $0xcc] sm:$0xf] %vm1474_vm4, %v1740_v39  ;;  %v1042_v58 = vmul.f32 %v2075_v46, %v971_v52  ;;  %v1110_v0 = vadd.f32 %v2080_v48, %v1039_v50  ;;  %v1176_v4 = vmax.f32 %v1112_v56, 0.0 }
 0x13e   :  { %v1074_v59 = vmul.f32 %v2075_v46, %v1003_v53  ;;  %v969_v60 = vld [vmem:[#allocation2 + $0xa8] sm:$0xff]  ;;  %711 = vst.msk [vmem:[#allocation2 + $0xd8] sm:$0xff] %vm683_vm3, %v1818_v54  ;;  %743 = vst.msk [vmem:[#allocation2 + $0x1d8] sm:$0xff] %vm683_vm3, %v1850_v55  ;;  %v1142_v1 = vadd.f32 %v2080_v48, %v1071_v51  ;;  %v1208_v5 = vmax.f32 %v1144_v57, 0.0  ;;  %v536_v30 = vpop.f32.mrb[29].mxu0  ;;  %v664_v31 = vpop.f32.mrb[29].mxu1 }
 0x13f   :  { %v1001_v61 = vld [vmem:[#allocation2 + $0x1a8] sm:$0xff]  ;;  %1492 = vst.msk [vmem:[#allocation8 + $0x44] sm:$0xf] %vm1474_vm4, %v1706_v47  ;;  %1524 = vst.msk [vmem:[#allocation8 + $0xc4] sm:$0xf] %vm1474_vm4, %v1738_v49  ;;  %v1040_v2 = vmul.f32 %v2075_v46, %v969_v60  ;;  %v1113_v6 = vadd.f32 %v2080_v48, %v1042_v58  ;;  %v1174_v8 = vmax.f32 %v1110_v0, 0.0  ;;  %v1711_v12 = vpack.c.bf16 %v1176_v4, %v1176_v4 }
 0x140   :  { %v1072_v3 = vmul.f32 %v2075_v46, %v1001_v61  ;;  %709 = vst.msk [vmem:[#allocation2 + $0xc8] sm:$0xff] %vm683_vm3, %v523_v62  ;;  %741 = vst.msk [vmem:[#allocation2 + $0x1c8] sm:$0xff] %vm683_vm3, %v651_v63  ;;  %v1145_v7 = vadd.f32 %v2080_v48, %v1074_v59  ;;  %v1206_v9 = vmax.f32 %v1142_v1, 0.0  ;;  %v1743_v13 = vpack.c.bf16 %v1208_v5, %v1208_v5  ;;  %v1822_v38 = vpop.f32.mrb[30].mxu0  ;;  %v1854_v39 = vpop.f32.mrb[30].mxu1 }
 0x141   :  { %v1111_v10 = vadd.f32 %v2080_v48, %v1040_v2  ;;  %v1177_v14 = vmax.f32 %v1113_v6, 0.0  ;;  %v1709_v16 = vpack.c.bf16 %v1174_v8, %v1174_v8  ;;  %v974_v20 = vld [vmem:[#allocation2 + $0xd0] sm:$0xff]  ;;  %1497 = vst.msk [vmem:[#allocation8 + $0x58] sm:$0xf] %vm1474_vm4, %v1711_v12  ;;  %v539_v47 = vpop.f32.mrb[31].mxu0  ;;  %v667_v49 = vpop.f32.mrb[31].mxu1 }
 0x142   :  { %v1143_v11 = vadd.f32 %v2080_v48, %v1072_v3  ;;  %v1209_v15 = vmax.f32 %v1145_v7, 0.0  ;;  %v1741_v17 = vpack.c.bf16 %v1206_v9, %v1206_v9  ;;  %v1006_v21 = vld [vmem:[#allocation2 + $0x1d0] sm:$0xff]  ;;  %1529 = vst.msk [vmem:[#allocation8 + $0xd8] sm:$0xf] %vm1474_vm4, %v1743_v13  ;;  %v1045_v26 = vmul.f32 %v2075_v46, %v974_v20 }
 0x143   :  { %v1175_v18 = vmax.f32 %v1111_v10, 0.0  ;;  %v1712_v24 = vpack.c.bf16 %v1177_v14, %v1177_v14  ;;  %v1077_v27 = vmul.f32 %v2075_v46, %v1006_v21  ;;  %v972_v28 = vld [vmem:[#allocation2 + $0xc0] sm:$0xff]  ;;  %714 = vst.msk [vmem:[#allocation2 + $0xf0] sm:$0xff] %vm683_vm3, %v1821_v22  ;;  %746 = vst.msk [vmem:[#allocation2 + $0x1f0] sm:$0xff] %vm683_vm3, %v1853_v23 }
 0x144   :  { %v1207_v19 = vmax.f32 %v1143_v11, 0.0  ;;  %v1744_v25 = vpack.c.bf16 %v1209_v15, %v1209_v15  ;;  %v1004_v29 = vld [vmem:[#allocation2 + $0x1c0] sm:$0xff]  ;;  %1495 = vst.msk [vmem:[#allocation8 + $0x50] sm:$0xf] %vm1474_vm4, %v1709_v16  ;;  %1527 = vst.msk [vmem:[#allocation8 + $0xd0] sm:$0xf] %vm1474_vm4, %v1741_v17  ;;  %v1043_v34 = vmul.f32 %v2075_v46, %v972_v28  ;;  %v1116_v40 = vadd.f32 %v2080_v48, %v1045_v26 }
 0x145   :  { %v1710_v32 = vpack.c.bf16 %v1175_v18, %v1175_v18  ;;  %v1075_v35 = vmul.f32 %v2075_v46, %v1004_v29  ;;  %v975_v36 = vld [vmem:[#allocation2 + $0xd8] sm:$0xff]  ;;  %712 = vst.msk [vmem:[#allocation2 + $0xe0] sm:$0xff] %vm683_vm3, %v536_v30  ;;  %744 = vst.msk [vmem:[#allocation2 + $0x1e0] sm:$0xff] %vm683_vm3, %v664_v31  ;;  %v1148_v41 = vadd.f32 %v2080_v48, %v1077_v27 }
 0x146   :  { %v1742_v33 = vpack.c.bf16 %v1207_v19, %v1207_v19  ;;  %v1007_v37 = vld [vmem:[#allocation2 + $0x1d8] sm:$0xff]  ;;  %1498 = vst.msk [vmem:[#allocation8 + $0x5c] sm:$0xf] %vm1474_vm4, %v1712_v24  ;;  %1530 = vst.msk [vmem:[#allocation8 + $0xdc] sm:$0xf] %vm1474_vm4, %v1744_v25  ;;  %v1046_v42 = vmul.f32 %v2075_v46, %v975_v36  ;;  %v1114_v50 = vadd.f32 %v2080_v48, %v1043_v34  ;;  %v1180_v54 = vmax.f32 %v1116_v40, 0.0 }
 0x147   :  { %v1078_v43 = vmul.f32 %v2075_v46, %v1007_v37  ;;  %v973_v44 = vld [vmem:[#allocation2 + $0xc8] sm:$0xff]  ;;  %715 = vst.msk [vmem:[#allocation2 + $0xf8] sm:$0xff] %vm683_vm3, %v1822_v38  ;;  %747 = vst.msk [vmem:[#allocation2 + $0x1f8] sm:$0xff] %vm683_vm3, %v1854_v39  ;;  %v1146_v51 = vadd.f32 %v2080_v48, %v1075_v35  ;;  %v1212_v55 = vmax.f32 %v1148_v41, 0.0 }
 0x148   :  { %v1005_v45 = vld [vmem:[#allocation2 + $0x1c8] sm:$0xff]  ;;  %1496 = vst.msk [vmem:[#allocation8 + $0x54] sm:$0xf] %vm1474_vm4, %v1710_v32  ;;  %1528 = vst.msk [vmem:[#allocation8 + $0xd4] sm:$0xf] %vm1474_vm4, %v1742_v33  ;;  %v1044_v52 = vmul.f32 %v2075_v46, %v973_v44  ;;  %v1117_v56 = vadd.f32 %v2080_v48, %v1046_v42  ;;  %v1178_v58 = vmax.f32 %v1114_v50, 0.0  ;;  %v1715_v62 = vpack.c.bf16 %v1180_v54, %v1180_v54 }
 0x149   :  { %v1076_v53 = vmul.f32 %v2075_v46, %v1005_v45  ;;  %713 = vst.msk [vmem:[#allocation2 + $0xe8] sm:$0xff] %vm683_vm3, %v539_v47  ;;  %745 = vst.msk [vmem:[#allocation2 + $0x1e8] sm:$0xff] %vm683_vm3, %v667_v49  ;;  %v1149_v57 = vadd.f32 %v2080_v48, %v1078_v43  ;;  %v1210_v59 = vmax.f32 %v1146_v51, 0.0  ;;  %v1747_v63 = vpack.c.bf16 %v1212_v55, %v1212_v55 }
 0x14a   :  { %v1115_v60 = vadd.f32 %v2080_v48, %v1044_v52  ;;  %v1181_v0 = vmax.f32 %v1117_v56, 0.0  ;;  %v1713_v2 = vpack.c.bf16 %v1178_v58, %v1178_v58  ;;  %v978_v6 = vld [vmem:[#allocation2 + $0xf0] sm:$0xff]  ;;  %1501 = vst.msk [vmem:[#allocation8 + $0x68] sm:$0xf] %vm1474_vm4, %v1715_v62 }
 0x14b   :  { %v1147_v61 = vadd.f32 %v2080_v48, %v1076_v53  ;;  %v1213_v1 = vmax.f32 %v1149_v57, 0.0  ;;  %v1745_v3 = vpack.c.bf16 %v1210_v59, %v1210_v59  ;;  %v1010_v7 = vld [vmem:[#allocation2 + $0x1f0] sm:$0xff]  ;;  %1533 = vst.msk [vmem:[#allocation8 + $0xe8] sm:$0xf] %vm1474_vm4, %v1747_v63  ;;  %v1049_v10 = vmul.f32 %v2075_v46, %v978_v6 }
 0x14c   :  { %v1179_v4 = vmax.f32 %v1115_v60, 0.0  ;;  %v1716_v8 = vpack.c.bf16 %v1181_v0, %v1181_v0  ;;  %v1081_v11 = vmul.f32 %v2075_v46, %v1010_v7  ;;  %v976_v12 = vld [vmem:[#allocation2 + $0xe0] sm:$0xff]  ;;  %1499 = vst.msk [vmem:[#allocation8 + $0x60] sm:$0xf] %vm1474_vm4, %v1713_v2 }
 0x14d   :  { %v1211_v5 = vmax.f32 %v1147_v61, 0.0  ;;  %v1748_v9 = vpack.c.bf16 %v1213_v1, %v1213_v1  ;;  %v1008_v13 = vld [vmem:[#allocation2 + $0x1e0] sm:$0xff]  ;;  %1531 = vst.msk [vmem:[#allocation8 + $0xe0] sm:$0xf] %vm1474_vm4, %v1745_v3  ;;  %v1047_v16 = vmul.f32 %v2075_v46, %v976_v12  ;;  %v1120_v20 = vadd.f32 %v2080_v48, %v1049_v10 }
 0x14e   :  { %v1714_v14 = vpack.c.bf16 %v1179_v4, %v1179_v4  ;;  %v1079_v17 = vmul.f32 %v2075_v46, %v1008_v13  ;;  %v979_v18 = vld [vmem:[#allocation2 + $0xf8] sm:$0xff]  ;;  %1502 = vst.msk [vmem:[#allocation8 + $0x6c] sm:$0xf] %vm1474_vm4, %v1716_v8  ;;  %v1152_v21 = vadd.f32 %v2080_v48, %v1081_v11 }
 0x14f   :  { %v1746_v15 = vpack.c.bf16 %v1211_v5, %v1211_v5  ;;  %v1011_v19 = vld [vmem:[#allocation2 + $0x1f8] sm:$0xff]  ;;  %1534 = vst.msk [vmem:[#allocation8 + $0xec] sm:$0xf] %vm1474_vm4, %v1748_v9  ;;  %v1050_v22 = vmul.f32 %v2075_v46, %v979_v18  ;;  %v1118_v26 = vadd.f32 %v2080_v48, %v1047_v16  ;;  %v1184_v30 = vmax.f32 %v1120_v20, 0.0 }
 0x150   :  { %v1082_v23 = vmul.f32 %v2075_v46, %v1011_v19  ;;  %v977_v24 = vld [vmem:[#allocation2 + $0xe8] sm:$0xff]  ;;  %1500 = vst.msk [vmem:[#allocation8 + $0x64] sm:$0xf] %vm1474_vm4, %v1714_v14  ;;  %v1150_v27 = vadd.f32 %v2080_v48, %v1079_v17  ;;  %v1216_v31 = vmax.f32 %v1152_v21, 0.0 }
 0x151   :  { %v1009_v25 = vld [vmem:[#allocation2 + $0x1e8] sm:$0xff]  ;;  %1532 = vst.msk [vmem:[#allocation8 + $0xe4] sm:$0xf] %vm1474_vm4, %v1746_v15  ;;  %v1048_v28 = vmul.f32 %v2075_v46, %v977_v24  ;;  %v1121_v32 = vadd.f32 %v2080_v48, %v1050_v22  ;;  %v1182_v34 = vmax.f32 %v1118_v26, 0.0  ;;  %v1719_v38 = vpack.c.bf16 %v1184_v30, %v1184_v30 }
 0x152   :  { %v1080_v29 = vmul.f32 %v2075_v46, %v1009_v25  ;;  %v1153_v33 = vadd.f32 %v2080_v48, %v1082_v23  ;;  %v1214_v35 = vmax.f32 %v1150_v27, 0.0  ;;  %v1751_v39 = vpack.c.bf16 %v1216_v31, %v1216_v31 }
 0x153   :  { %v1119_v36 = vadd.f32 %v2080_v48, %v1048_v28  ;;  %v1185_v40 = vmax.f32 %v1121_v32, 0.0  ;;  %v1717_v42 = vpack.c.bf16 %v1182_v34, %v1182_v34  ;;  %1505 = vst.msk [vmem:[#allocation8 + $0x78] sm:$0xf] %vm1474_vm4, %v1719_v38 }
 0x154   :  { %v1151_v37 = vadd.f32 %v2080_v48, %v1080_v29  ;;  %v1217_v41 = vmax.f32 %v1153_v33, 0.0  ;;  %v1749_v46 = vpack.c.bf16 %v1214_v35, %v1214_v35  ;;  %1537 = vst.msk [vmem:[#allocation8 + $0xf8] sm:$0xf] %vm1474_vm4, %v1751_v39 }
 0x155   :  { %v1183_v43 = vmax.f32 %v1119_v36, 0.0  ;;  %v1720_v45 = vpack.c.bf16 %v1185_v40, %v1185_v40  ;;  %1503 = vst.msk [vmem:[#allocation8 + $0x70] sm:$0xf] %vm1474_vm4, %v1717_v42 }
 0x156   :  { %v1215_v44 = vmax.f32 %v1151_v37, 0.0  ;;  %v1752_v47 = vpack.c.bf16 %v1217_v41, %v1217_v41  ;;  %1535 = vst.msk [vmem:[#allocation8 + $0xf0] sm:$0xf] %vm1474_vm4, %v1749_v46 }
 0x157   :  { %v1718_v48 = vpack.c.bf16 %v1183_v43, %v1183_v43  ;;  %1506 = vst.msk [vmem:[#allocation8 + $0x7c] sm:$0xf] %vm1474_vm4, %v1720_v45 }
 0x158   :  { %v1750_v49 = vpack.c.bf16 %v1215_v44, %v1215_v44  ;;  %1538 = vst.msk [vmem:[#allocation8 + $0xfc] sm:$0xf] %vm1474_vm4, %v1752_v47 }
 0x159   :  { %1504 = vst.msk [vmem:[#allocation8 + $0x74] sm:$0xf] %vm1474_vm4, %v1718_v48 }
 0x15a   :  { %1536 = vst.msk [vmem:[#allocation8 + $0xf4] sm:$0xf] %vm1474_vm4, %v1750_v49 }
 0x15b   :  { %1954 = shalt.err (!%p1951_p6)
}
 0x15c   :  { %s1955_s20 = scalar_lea.hbm %s2349_s4, 4096 }
 0x15d   :  { %p1956_p7 = scmp.ne.s32.totalorder %s2349_s4, %s1955_s20  ;;  %p1959_p8 = scmp.lt.u32.totalorder %s1955_s20, %s2349_s4 }
 0x15f   :  { %p1961_p9 = pnand %p1959_p8, %p1956_p7 }
 0x161   :  { %1964 = shalt.err (!%p1961_p9)
}
 0x162   :  { %1550 = dma.vmem_to_hbm [thread:$0]  %s1545_s3, 4096, %s2349_s4, [#allocation5], %s1972_s25, %s1972_s25, %s1973_s26  }
 0x163   :  { %1969 = dma.done.wait [#allocation5], 4096  }
 0x164   :  { %1970 = vsyncadd [#allocation5], 4294963200 }
 0x165   :  { %1554 = vsyncpa [#allocation4], 1 }
 0x166   :  { %1555 = vsyncpa [#allocation7], 1 }
 0x167   :  { %1556 = vsyncpa [#allocation5], 1 }

</bundles_post_ra>
